<compile_context>
chip_gen: v5e
topology: v5e:2x2
jax: 0.10.0
libtpu: 0.0.40
codegen_flags: <defaults>
</compile_context>

<pallas_src>
import functools

import jax
import jax.numpy as jnp
from jax.experimental import pallas as pl
from jax.experimental.pallas import tpu as pltpu


def _pick_tile(dim, pref, align):
    """Largest tile <= pref that divides dim and is a multiple of align,
    falling back to the full dim (always legal for the (8,128) rule)."""
    if dim <= pref:
        return dim
    t = (pref // align) * align
    while t >= align:
        if dim % t == 0:
            return t
        t -= align
    return dim


# ---------------------------------------------------------------------------
# Kernel 1: tiled dense projection  y = x @ W + b   (W pre-transposed (in,out))
# ---------------------------------------------------------------------------
def _linear_kernel_acc(x_ref, w_ref, b_ref, o_ref, acc_ref):
    k = pl.program_id(2)

    @pl.when(k == 0)
    def _():
        acc_ref[...] = jnp.zeros_like(acc_ref)

    acc_ref[...] += jnp.dot(x_ref[...], w_ref[...],
                            preferred_element_type=jnp.float32)

    @pl.when(k == pl.num_programs(2) - 1)
    def _():
        o_ref[...] = (acc_ref[...] + b_ref[...]).astype(o_ref.dtype)


def _linear_kernel_single(x_ref, w_ref, b_ref, o_ref):
    acc = jnp.dot(x_ref[...], w_ref[...], preferred_element_type=jnp.float32)
    o_ref[...] = (acc + b_ref[...]).astype(o_ref.dtype)


def linear(x, w_t, b, *, out_dtype=None, tm=256, tn=256, tk=512):
    """x: (M, Din), w_t: (Din, Dout), b: (1, Dout) f32 -> (M, Dout)."""
    M, K = x.shape
    N = w_t.shape[1]
    out_dtype = out_dtype if out_dtype is not None else x.dtype

    tm = _pick_tile(M, tm, 8)
    tn = _pick_tile(N, tn, 128)
    tk = _pick_tile(K, tk, 128)
    nk = K // tk

    if nk == 1:
        # Contraction fits in one tile: no accumulator scratch, 2-D grid.
        return pl.pallas_call(
            _linear_kernel_single,
            out_shape=jax.ShapeDtypeStruct((M, N), out_dtype),
            grid=(M // tm, N // tn),
            in_specs=[
                pl.BlockSpec((tm, K), lambda i, j: (i, 0)),
                pl.BlockSpec((K, tn), lambda i, j: (0, j)),
                pl.BlockSpec((1, tn), lambda i, j: (0, j)),
            ],
            out_specs=pl.BlockSpec((tm, tn), lambda i, j: (i, j)),
            compiler_params=pltpu.CompilerParams(
                dimension_semantics=("parallel", "parallel"),
                vmem_limit_bytes=48 * 1024 * 1024,
            ),
        )(x, w_t, b)

    return pl.pallas_call(
        _linear_kernel_acc,
        out_shape=jax.ShapeDtypeStruct((M, N), out_dtype),
        grid=(M // tm, N // tn, nk),
        in_specs=[
            pl.BlockSpec((tm, tk), lambda i, j, k: (i, k)),
            pl.BlockSpec((tk, tn), lambda i, j, k: (k, j)),
            pl.BlockSpec((1, tn), lambda i, j, k: (0, j)),
        ],
        out_specs=pl.BlockSpec((tm, tn), lambda i, j, k: (i, j)),
        scratch_shapes=[pltpu.VMEM((tm, tn), jnp.float32)],
        compiler_params=pltpu.CompilerParams(
            dimension_semantics=("parallel", "parallel", "arbitrary"),
            vmem_limit_bytes=48 * 1024 * 1024,
        ),
    )(x, w_t, b)


# ---------------------------------------------------------------------------
# Kernel 2: batched-head attention: scores -> softmax -> weighted sum of V
# ---------------------------------------------------------------------------
def _attention_kernel(q_ref, k_ref, v_ref, o_ref, w_ref, *, scaling):
    # Scale the (small) Q tile rather than the (t_t, S) score tile: fewer VPU
    # ops; matches the module's `q = q_proj(query) * scaling`.
    q = q_ref[...] * jnp.asarray(scaling, dtype=q_ref.dtype)   # (bh_t, t_t, Hd)
    k = k_ref[...]                                             # (bh_t, S,  Hd)
    v = v_ref[...]                                             # (bh_t, S,  Hd)

    # MXU consumes K via contraction on the last dims (no .T copy).
    s = jnp.einsum("bqd,bkd->bqk", q, k,
                   preferred_element_type=jnp.float32)

    # Softmax in f32 (safe on v5e's non-bf16 VPU/EUP as well).
    s = s - jnp.max(s, axis=-1, keepdims=True)
    p = jnp.exp(s)
    denom = jnp.sum(p, axis=-1, keepdims=True)
    p = p * pl.reciprocal(denom, approx=True)

    # TODO(synk): attn_mask / key_padding_mask / dropout / incremental KV cache
    # of the original module are not exercised here (defaults are None / 0.0).
    w_ref[...] = p.astype(w_ref.dtype)
    o_ref[...] = jnp.einsum("bqk,bkd->bqd", p.astype(v.dtype), v,
                            preferred_element_type=jnp.float32
                            ).astype(o_ref.dtype)


def attention(qh, kh, vh, *, scaling, bh_tile=8, t_tile=128):
    """qh: (BH, T, Hd), kh/vh: (BH, S, Hd) -> ((BH, T, Hd), (BH, T, S) f32)."""
    BH, T, Hd = qh.shape
    S = kh.shape[1]

    bh_t = _pick_tile(BH, bh_tile, 1)
    t_t = _pick_tile(T, t_tile, 8)
    grid = (BH // bh_t, T // t_t)

    kernel = functools.partial(_attention_kernel, scaling=scaling)

    # TODO(synk): for very long S with attn_weights unneeded, flash-tile the S
    # axis with online softmax to bound VMEM (not possible here because the
    # module's contract returns the full (T,S) attention weights).
    return pl.pallas_call(
        kernel,
        out_shape=(
            jax.ShapeDtypeStruct((BH, T, Hd), qh.dtype),
            jax.ShapeDtypeStruct((BH, T, S), jnp.float32),
        ),
        grid=grid,
        in_specs=[
            pl.BlockSpec((bh_t, t_t, Hd), lambda b, t: (b, t, 0)),
            pl.BlockSpec((bh_t, S, Hd), lambda b, t: (b, 0, 0)),
            pl.BlockSpec((bh_t, S, Hd), lambda b, t: (b, 0, 0)),
        ],
        out_specs=(
            pl.BlockSpec((bh_t, t_t, Hd), lambda b, t: (b, t, 0)),
            pl.BlockSpec((bh_t, t_t, S), lambda b, t: (b, t, 0)),
        ),
        compiler_params=pltpu.CompilerParams(
            dimension_semantics=("parallel", "parallel"),
            vmem_limit_bytes=48 * 1024 * 1024,
        ),
    )(qh, kh, vh)


# ---------------------------------------------------------------------------
# Module-equivalent wrapper
# ---------------------------------------------------------------------------
def init_self_attention_params(key, embed_dim, dtype=jnp.float32):
    ks = jax.random.split(key, 4)

    def w(k, dout):  # stored pre-transposed: (in, out)
        return (0.02 * jax.random.normal(k, (embed_dim, dout))).astype(dtype)

    def b(k, dout):
        return (0.01 * jax.random.normal(k, (1, dout))).astype(dtype)

    # Q/K/V weights fused along the output dim: columns [q(E) | k(E) | v(E)].
    return {
        "qkv_w": w(ks[0], 3 * embed_dim), "qkv_b": b(ks[1], 3 * embed_dim),
        "o_w": w(ks[2], embed_dim), "o_b": b(ks[3], embed_dim),
    }


def self_attention_forward(query, params, num_heads, *,
                           compute_dtype=jnp.bfloat16):
    """query: (T, B, E) -> (attn_output (T, B, E), attn_weights (B, H, T, T)).

    compute_dtype: dtype for MXU operands (accumulation + softmax stay f32).
    Pass jnp.float32 (or None) for full-f32 matmuls.
    """
    T, B, E = query.shape
    H = num_heads
    Hd = E // H
    assert Hd * H == E, "embed_dim must be divisible by num_heads"
    scaling = Hd ** (-0.5)

    out_dtype = query.dtype
    cd = compute_dtype if compute_dtype is not None else query.dtype

    # Fused Q/K/V projection: x streamed from HBM once.
    x = query.reshape(T * B, E).astype(cd)
    qkv = linear(x, params["qkv_w"].astype(cd), params["qkv_b"].astype(jnp.float32),
                 out_dtype=cd)                       # (T*B, 3E)

    # (T*B, 3E) -> (3, B*H, T, Hd) with BH = b*H + h (torch _shape layout).
    qkv = qkv.reshape(T, B, 3, H, Hd)
    qkv = jnp.transpose(qkv, (2, 1, 3, 0, 4)).reshape(3, B * H, T, Hd)
    qh, kh, vh = qkv[0], qkv[1], qkv[2]

    attn_out, attn_w = attention(qh, kh, vh, scaling=scaling)

    # (B*H, T, Hd) -> (T, B*H, Hd) -> (T*B, E) -> out_proj -> (T, B, E)
    out2d = attn_out.transpose(1, 0, 2).reshape(T * B, E).astype(cd)
    out = linear(out2d, params["o_w"].astype(cd),
                 params["o_b"].astype(jnp.float32),
                 out_dtype=out_dtype).reshape(T, B, E)

    attn_w = attn_w.reshape(B, H, T, T)
    return out, attn_w


if __name__ == "__main__":
    embed_dim, num_heads = 32, 4
    seq, batch = 8, 2

    key = jax.random.PRNGKey(0)
    k_params, k_x = jax.random.split(key)
    params = init_self_attention_params(k_params, embed_dim)
    query = jax.random.normal(k_x, (seq, batch, embed_dim), dtype=jnp.float32)

    attn_output, attn_weights = self_attention_forward(query, params, num_heads)
    jax.block_until_ready((attn_output, attn_weights))

    assert attn_output.shape == (seq, batch, embed_dim)
    assert attn_output.dtype == query.dtype
    assert attn_weights.shape == (batch, num_heads, seq, seq)
    # Softmax rows should sum (approximately, due to approx reciprocal) to 1.
    assert jnp.allclose(attn_weights.sum(-1), 1.0, atol=1e-2)
    print("KERNEL_OK")
</pallas_src>

<mosaic_0001>
module attributes {stable_mosaic.version = 11 : i64} {
  func.func @_linear_kernel_single(%arg0: i32, %arg1: i32, %arg2: memref<16x32xbf16, #tpu.memory_space<vmem>>, %arg3: memref<32x96xbf16, #tpu.memory_space<vmem>>, %arg4: memref<1x96xf32, #tpu.memory_space<vmem>>, %arg5: memref<16x96xbf16, #tpu.memory_space<vmem>>) attributes {dimension_semantics = [#tpu.dimension_semantics<parallel>, #tpu.dimension_semantics<parallel>], iteration_bounds = array<i64: 1, 1>, scalar_prefetch = 0 : i64, scratch_operands = 0 : i64, tpu.core_type = #tpu.core_type<tc>, window_params = [{transform_indices = @transform_0, window_bounds = array<i64: 16, 32>}, {transform_indices = @transform_1, window_bounds = array<i64: 32, 96>}, {transform_indices = @transform_2, window_bounds = array<i64: 1, 96>}, {transform_indices = @transform_3, window_bounds = array<i64: 16, 96>}]} {
    %c0 = arith.constant 0 : index
    %c0_0 = arith.constant 0 : index
    %0 = vector.load %arg2[%c0, %c0_0] : memref<16x32xbf16, #tpu.memory_space<vmem>>, vector<16x32xbf16>
    %c0_1 = arith.constant 0 : index
    %c0_2 = arith.constant 0 : index
    %1 = vector.load %arg3[%c0_1, %c0_2] : memref<32x96xbf16, #tpu.memory_space<vmem>>, vector<32x96xbf16>
    %cst = arith.constant dense<0.000000e+00> : vector<16x96xf32>
    %2 = tpu.matmul %0, %1, %cst {dimension_numbers = #tpu.dot_dimension_numbers<[1], [0], [0], [1], [0, 0, 1, 1], [], []>} : vector<16x32xbf16>, vector<32x96xbf16>, vector<16x96xf32> -> vector<16x96xf32>
    %c0_3 = arith.constant 0 : index
    %c0_4 = arith.constant 0 : index
    %3 = vector.load %arg4[%c0_3, %c0_4] : memref<1x96xf32, #tpu.memory_space<vmem>>, vector<1x96xf32>
    %4 = vector.broadcast %3 : vector<1x96xf32> to vector<16x96xf32>
    %5 = arith.addf %2, %4 : vector<16x96xf32>
    %6 = arith.truncf %5 : vector<16x96xf32> to vector<16x96xbf16>
    %c0_5 = arith.constant 0 : index
    %c0_6 = arith.constant 0 : index
    %7 = vector.load %arg5[%c0_5, %c0_6] : memref<16x96xbf16, #tpu.memory_space<vmem>>, vector<16x96xbf16>
    tpu.vector_store %arg5[%c0_5, %c0_6], %6 {strides = array<i32>} : memref<16x96xbf16, #tpu.memory_space<vmem>>, vector<16x96xbf16>,
    return
  }
  func.func @transform_0(%arg0: i32, %arg1: i32) -> (i32, i32) {
    %c0_i32 = arith.constant 0 : i32
    %c0_i32_0 = arith.constant 0 : i32
    return %arg0, %c0_i32 : i32, i32
  }
  func.func @transform_1(%arg0: i32, %arg1: i32) -> (i32, i32) {
    %c0_i32 = arith.constant 0 : i32
    %c0_i32_0 = arith.constant 0 : i32
    return %c0_i32, %arg1 : i32, i32
  }
  func.func @transform_2(%arg0: i32, %arg1: i32) -> (i32, i32) {
    %c0_i32 = arith.constant 0 : i32
    %c0_i32_0 = arith.constant 0 : i32
    return %c0_i32, %arg1 : i32, i32
  }
  func.func @transform_3(%arg0: i32, %arg1: i32) -> (i32, i32) {
    %c0_i32 = arith.constant 0 : i32
    return %arg0, %arg1 : i32, i32
  }
}

</mosaic_0001>

<bundles_post_ra>
// kernel: tpu_custom_call.1
= control target key start
LH: loop header
LB: loop body
LE: loop exit
PB: predicated region body
PF: predicated region fallthrough
CT: control target
= control target key end

     0   :  { %8 = vsyncpa [#allocation3], 0  ;;  %s264_s0 = inlined_call_operand.hbm [shape: bf16[16,32], index: 0, kind: input, shape index: {}]   ;;  %s265_s1 = inlined_call_operand.hbm [shape: bf16[32,96], index: 1, kind: input, shape index: {}]   ;;  %s266_s2 = inlined_call_operand.vmem [shape: f32[1,96], index: 2, kind: input, shape index: {}]   ;;  %s267_s3 = inlined_call_operand.hbm [shape: bf16[16,96], index: 3, kind: output, shape index: {}]  }
   0x1   :  { %9 = vsyncpa [#allocation6], 0 }
   0x2   :  { %10 = vsyncpa [#allocation4], 0  ;;  %s15_s14 = sshll.u32 %s264_s0, 4  ;;  %s218_s15 = smov [#allocation2]   ;;  %s16_s14 = int_to_ptr.hbm [resolvable:$true] %s15_s14 }
   0x3   :  { %s17_s16 = sshll.u32 %s218_s15, 4  ;;  %s28_s19 = sshll.u32 %s265_s1, 4  ;;  %s18_s16 = int_to_ptr.vmem [resolvable:$true] %s17_s16  ;;  %s29_s19 = int_to_ptr.hbm [resolvable:$true] %s28_s19 }
   0x4   :  { %s219_s20 = smov 64   ;;  %s220_s21 = smov 4  }
   0x5   :  { %23 = dma.hbm_to_vmem [thread:$0]  %s16_s14, 128, %s18_s16, [#allocation3], %s219_s20, %s219_s20, %s220_s21  }
   0x6   :  { %s221_s22 = smov [#allocation5]  }
   0x7   :  { %s30_s23 = sshll.u32 %s221_s22, 4  ;;  %s31_s23 = int_to_ptr.vmem [resolvable:$true] %s30_s23 }
   0x8   :  { %36 = dma.hbm_to_vmem [thread:$0]  %s29_s19, 256, %s31_s23, [#allocation6], %s219_s20, %s219_s20, %s220_s21  }
   0x9   :  { %212 = dma.done.wait [#allocation3], 128  }
   0xa   :  { %213 = vsyncadd [#allocation3], 4294967168 }
   0xb   :  { %214 = dma.done.wait [#allocation6], 256  }
   0xc   :  { %215 = vsyncadd [#allocation6], 4294967040  ;;  %v133_v0 = vld [vmem:[#allocation5 + $0x8] sm:$0xff]  ;;  %v132_v1 = vld [vmem:[#allocation5] sm:$0xff]  ;;  %vm75_vm0 = vcmask 261120   ;;  %vm95_vm1 = vcmask 781312  }
   0xd   :  { %85 = vmatpush.bf16.msra.mxu0 %v133_v0  ;;  %v131_v2 = vld [vmem:[#allocation2] sm:$0xff]  ;;  %s222_s24 = smov [#allocation7]   ;;  %s104_s28 = sshll.u32 %s267_s3, 4  ;;  %s105_s28 = int_to_ptr.hbm [resolvable:$true] %s104_s28 }
   0xe   :  { %v139_v3 = vld [vmem:[%s266_s2] ss:$0 sm:$0xff]  ;;  %s102_s25 = sshll.u32 %s222_s24, 4  ;;  %s103_s25 = int_to_ptr.vmem [resolvable:$true] %s102_s25 }
  0x11   :  { %86 = vmatpush.bf16.msra.mxu0 %v132_v1 }
  0x14   :  { %130 = vmatmul.msk.bf16.vlgmr.msra.gmra.mxu0 %vm75_vm0, %v131_v2 }
  0x91   :  { %v88_v4 = vpop.f32.mrf.mxu0 }
  0x92   :  { %v89_v5 = vadd.f32 %v139_v3, %v88_v4 }
  0x94   :  { %v93_v6 = vpack.c.bf16 %v89_v5, %v89_v5 }
  0x96   :  { %96 = vst.msk [vmem:[#allocation7] sm:$0xf] %vm95_vm1, %v93_v6 }
  0x99   :  { %v90_v7 = vpop.f32.mrf.mxu0 }
  0x9a   :  { %v91_v8 = vadd.f32 %v139_v3, %v90_v7 }
  0x9c   :  { %v94_v9 = vpack.c.bf16 %v91_v8, %v91_v8 }
  0x9e   :  { %97 = vst.msk [vmem:[#allocation7 + $0x4] sm:$0xf] %vm95_vm1, %v94_v9 }
  0x9f   :  { %110 = dma.vmem_to_hbm [thread:$0]  %s103_s25, 128, %s105_s28, [#allocation4], %s219_s20, %s219_s20, %s220_s21  }
  0xa0   :  { %216 = dma.done.wait [#allocation4], 128  }
  0xa1   :  { %217 = vsyncadd [#allocation4], 4294967168 }
  0xa2   :  { %115 = vsyncpa [#allocation3], 1 }
  0xa3   :  { %116 = vsyncpa [#allocation6], 1 }
  0xa4   :  { %117 = vsyncpa [#allocation4], 1 }

</bundles_post_ra>
